<compile_context>
chip_gen: v6e
topology: v6e:2x2x1
jax: 0.10.0
libtpu: 0.0.40
codegen_flags: <defaults>
</compile_context>

<pallas_src>
import functools

import jax
import jax.numpy as jnp
from jax.experimental import pallas as pl
from jax.experimental.pallas import tpu as pltpu


def _mlp_kernel(x_ref, w1_ref, b1_ref, w2_ref, b2_ref, o_ref):
    # x_ref:  (TILE_M, state_dim)
    # w1_ref: (state_dim, hidden_pad)    b1_ref: (1, hidden_pad)
    # w2_ref: (hidden_pad, sample_pad)   b2_ref: (1, sample_pad)
    # o_ref:  (TILE_M, sample_pad)
    x = x_ref[...]
    h = jnp.dot(x, w1_ref[...], preferred_element_type=jnp.float32)
    h = jnp.maximum(h + b1_ref[...], 0.0)            # bias + ReLU (VPU)
    out = jnp.dot(h.astype(w2_ref.dtype), w2_ref[...],
                  preferred_element_type=jnp.float32)
    out = out + b2_ref[...]
    o_ref[...] = out.astype(o_ref.dtype)


def _round_up(a, b):
    return (a + b - 1) // b * b


@functools.partial(jax.jit, static_argnames=("tile_m",))
def states_to_samples(data, w1, b1, w2, b2, *, tile_m=1024):
    """Linear(state->hidden) -> ReLU -> Linear(hidden->sample) over the last
    axis of `data`.

    Weights are in PyTorch nn.Linear layout:
      w1: (hidden_dim, state_dim), b1: (hidden_dim,)
      w2: (sample_dim, hidden_dim), b2: (sample_dim,)
    """
    state_dim = data.shape[-1]
    hidden_dim = w1.shape[0]
    sample_dim = w2.shape[0]
    lead_shape = data.shape[:-1]

    x2d = data.reshape(-1, state_dim)
    n = x2d.shape[0]

    # Row tile: as large as requested but never bigger than the (8-rounded)
    # row count; pad n up to a multiple so every grid step is a full block.
    tm = min(tile_m, _round_up(max(n, 1), 8))
    n_pad = _round_up(n, tm)
    if n_pad != n:
        x2d = jnp.pad(x2d, ((0, n_pad - n), (0, 0)))

    # Pad feature dims of the (resident) weights up to lane width so every
    # intermediate/output tile is (8,128)-aligned and stores are unmasked.
    hidden_pad = _round_up(hidden_dim, 128)
    sample_pad = _round_up(sample_dim, 128)

    # One-time per-call transpose + zero-pad (fused by XLA outside the kernel).
    w1_t = jnp.pad(w1.T, ((0, 0), (0, hidden_pad - hidden_dim)))
    b1_p = jnp.pad(b1, ((0, hidden_pad - hidden_dim),)).reshape(1, hidden_pad)
    w2_t = jnp.pad(w2.T, ((0, hidden_pad - hidden_dim),
                          (0, sample_pad - sample_dim)))
    b2_p = jnp.pad(b2, ((0, sample_pad - sample_dim),)).reshape(1, sample_pad)

    grid = (n_pad // tm,)

    out2d = pl.pallas_call(
        _mlp_kernel,
        out_shape=jax.ShapeDtypeStruct((n_pad, sample_pad), data.dtype),
        grid=grid,
        in_specs=[
            pl.BlockSpec((tm, state_dim), lambda i: (i, 0)),            # streamed
            pl.BlockSpec((state_dim, hidden_pad), lambda i: (0, 0)),    # resident
            pl.BlockSpec((1, hidden_pad), lambda i: (0, 0)),            # resident
            pl.BlockSpec((hidden_pad, sample_pad), lambda i: (0, 0)),   # resident
            pl.BlockSpec((1, sample_pad), lambda i: (0, 0)),            # resident
        ],
        out_specs=pl.BlockSpec((tm, sample_pad), lambda i: (i, 0)),
        compiler_params=pltpu.CompilerParams(
            dimension_semantics=("parallel",)),
    )(x2d, w1_t, b1_p, w2_t, b2_p)

    out2d = out2d[:n, :sample_dim]
    return out2d.reshape(*lead_shape, sample_dim)


def _reference(data, w1, b1, w2, b2):
    return jnp.maximum(data @ w1.T + b1, 0.0) @ w2.T + b2


if __name__ == "__main__":
    # Small shapes consistent with the module:
    #   data: (batch=2, seq=8, state_dim=32), hidden_dim=64, sample_dim=16
    batch, seq, state_dim = 2, 8, 32
    hidden_dim, sample_dim = 64, 16

    key = jax.random.PRNGKey(0)
    k_x, k_w1, k_b1, k_w2, k_b2 = jax.random.split(key, 5)

    data = jax.random.normal(k_x, (batch, seq, state_dim), dtype=jnp.float32)

    # PyTorch nn.Linear parameter shapes: W = (out, in), b = (out,)
    w1 = 0.1 * jax.random.normal(k_w1, (hidden_dim, state_dim), dtype=jnp.float32)
    b1 = 0.1 * jax.random.normal(k_b1, (hidden_dim,), dtype=jnp.float32)
    w2 = 0.1 * jax.random.normal(k_w2, (sample_dim, hidden_dim), dtype=jnp.float32)
    b2 = 0.1 * jax.random.normal(k_b2, (sample_dim,), dtype=jnp.float32)

    ref = _reference(data, w1, b1, w2, b2)

    # Case 1: default tile (single grid step at this small size).
    out = states_to_samples(data, w1, b1, w2, b2)
    out = jax.block_until_ready(out)
    assert out.shape == (batch, seq, sample_dim)
    assert jnp.allclose(out, ref, atol=1e-5, rtol=1e-5)

    # Case 2: force a tiny tile to exercise the multi-step grid path.
    out_tiled = states_to_samples(data, w1, b1, w2, b2, tile_m=8)
    out_tiled = jax.block_until_ready(out_tiled)
    assert jnp.allclose(out_tiled, ref, atol=1e-5, rtol=1e-5)

    # Case 3: ragged row count (forces row padding + multi-step grid).
    data_r = jax.random.normal(k_x, (2, 5, state_dim), dtype=jnp.float32)
    out_r = states_to_samples(data_r, w1, b1, w2, b2, tile_m=8)
    out_r = jax.block_until_ready(out_r)
    ref_r = _reference(data_r, w1, b1, w2, b2)
    assert out_r.shape == (2, 5, sample_dim)
    assert jnp.allclose(out_r, ref_r, atol=1e-5, rtol=1e-5)

    print("KERNEL_OK")
</pallas_src>

<mosaic_0001>
module attributes {stable_mosaic.version = 11 : i64} {
  func.func @_mlp_kernel(%arg0: i32, %arg1: memref<16x32xf32, #tpu.memory_space<vmem>>, %arg2: memref<32x128xf32, #tpu.memory_space<vmem>>, %arg3: memref<1x128xf32, #tpu.memory_space<vmem>>, %arg4: memref<128x128xf32, #tpu.memory_space<vmem>>, %arg5: memref<1x128xf32, #tpu.memory_space<vmem>>, %arg6: memref<16x128xf32, #tpu.memory_space<vmem>>) attributes {dimension_semantics = [#tpu.dimension_semantics<parallel>], iteration_bounds = array<i64: 1>, scalar_prefetch = 0 : i64, scratch_operands = 0 : i64, tpu.core_type = #tpu.core_type<tc>, window_params = [{transform_indices = @transform_0, window_bounds = array<i64: 16, 32>}, {pipeline_mode = #tpu.pipeline_mode<synchronous>, transform_indices = @transform_1, window_bounds = array<i64: 32, 128>}, {pipeline_mode = #tpu.pipeline_mode<synchronous>, transform_indices = @transform_2, window_bounds = array<i64: 1, 128>}, {pipeline_mode = #tpu.pipeline_mode<synchronous>, transform_indices = @transform_3, window_bounds = array<i64: 128, 128>}, {pipeline_mode = #tpu.pipeline_mode<synchronous>, transform_indices = @transform_4, window_bounds = array<i64: 1, 128>}, {transform_indices = @transform_5, window_bounds = array<i64: 16, 128>}]} {
    %c0 = arith.constant 0 : index
    %c0_0 = arith.constant 0 : index
    %0 = vector.load %arg1[%c0, %c0_0] : memref<16x32xf32, #tpu.memory_space<vmem>>, vector<16x32xf32>
    %c0_1 = arith.constant 0 : index
    %c0_2 = arith.constant 0 : index
    %1 = vector.load %arg2[%c0_1, %c0_2] : memref<32x128xf32, #tpu.memory_space<vmem>>, vector<32x128xf32>
    %cst = arith.constant dense<0.000000e+00> : vector<16x128xf32>
    %2 = tpu.matmul %0, %1, %cst {dimension_numbers = #tpu.dot_dimension_numbers<[1], [0], [0], [1], [0, 0, 1, 1], [], []>} : vector<16x32xf32>, vector<32x128xf32>, vector<16x128xf32> -> vector<16x128xf32>
    %c0_3 = arith.constant 0 : index
    %c0_4 = arith.constant 0 : index
    %3 = vector.load %arg3[%c0_3, %c0_4] : memref<1x128xf32, #tpu.memory_space<vmem>>, vector<1x128xf32>
    %4 = vector.broadcast %3 : vector<1x128xf32> to vector<16x128xf32>
    %5 = arith.addf %2, %4 : vector<16x128xf32>
    %cst_5 = arith.constant 0.000000e+00 : f32
    %6 = vector.broadcast %cst_5 : f32 to vector<16x128xf32>
    %7 = arith.maximumf %5, %6 : vector<16x128xf32>
    %c0_6 = arith.constant 0 : index
    %c0_7 = arith.constant 0 : index
    %8 = vector.load %arg4[%c0_6, %c0_7] : memref<128x128xf32, #tpu.memory_space<vmem>>, vector<128x128xf32>
    %cst_8 = arith.constant dense<0.000000e+00> : vector<16x128xf32>
    %9 = tpu.matmul %7, %8, %cst_8 {dimension_numbers = #tpu.dot_dimension_numbers<[1], [0], [0], [1], [0, 0, 1, 1], [], []>} : vector<16x128xf32>, vector<128x128xf32>, vector<16x128xf32> -> vector<16x128xf32>
    %c0_9 = arith.constant 0 : index
    %c0_10 = arith.constant 0 : index
    %10 = vector.load %arg5[%c0_9, %c0_10] : memref<1x128xf32, #tpu.memory_space<vmem>>, vector<1x128xf32>
    %11 = vector.broadcast %10 : vector<1x128xf32> to vector<16x128xf32>
    %12 = arith.addf %9, %11 : vector<16x128xf32>
    %c0_11 = arith.constant 0 : index
    %c0_12 = arith.constant 0 : index
    %13 = vector.load %arg6[%c0_11, %c0_12] : memref<16x128xf32, #tpu.memory_space<vmem>>, vector<16x128xf32>
    tpu.vector_store %arg6[%c0_11, %c0_12], %12 {strides = array<i32>} : memref<16x128xf32, #tpu.memory_space<vmem>>, vector<16x128xf32>,
    return
  }
  func.func @transform_0(%arg0: i32) -> (i32, i32) {
    %c0_i32 = arith.constant 0 : i32
    %c0_i32_0 = arith.constant 0 : i32
    return %arg0, %c0_i32 : i32, i32
  }
  func.func @transform_1(%arg0: i32) -> (i32, i32) {
    %c0_i32 = arith.constant 0 : i32
    %c0_i32_0 = arith.constant 0 : i32
    %c0_i32_1 = arith.constant 0 : i32
    return %c0_i32, %c0_i32_0 : i32, i32
  }
  func.func @transform_2(%arg0: i32) -> (i32, i32) {
    %c0_i32 = arith.constant 0 : i32
    %c0_i32_0 = arith.constant 0 : i32
    %c0_i32_1 = arith.constant 0 : i32
    return %c0_i32, %c0_i32_0 : i32, i32
  }
  func.func @transform_3(%arg0: i32) -> (i32, i32) {
    %c0_i32 = arith.constant 0 : i32
    %c0_i32_0 = arith.constant 0 : i32
    %c0_i32_1 = arith.constant 0 : i32
    return %c0_i32, %c0_i32_0 : i32, i32
  }
  func.func @transform_4(%arg0: i32) -> (i32, i32) {
    %c0_i32 = arith.constant 0 : i32
    %c0_i32_0 = arith.constant 0 : i32
    %c0_i32_1 = arith.constant 0 : i32
    return %c0_i32, %c0_i32_0 : i32, i32
  }
  func.func @transform_5(%arg0: i32) -> (i32, i32) {
    %c0_i32 = arith.constant 0 : i32
    %c0_i32_0 = arith.constant 0 : i32
    return %arg0, %c0_i32 : i32, i32
  }
}

</mosaic_0001>

<bundles_post_ra>
// kernel: states_to_samples.1
= control target key start
LH: loop header
LB: loop body
LE: loop exit
PB: predicated region body
PF: predicated region fallthrough
CT: control target
= control target key end

     0   :  { %vm33_vm0 = vcmask 261120   ;;  %s405_s1 = inlined_call_operand.vmem [shape: f32[32,128], index: 1, kind: input, shape index: {}]   ;;  %s406_s0 = inlined_call_operand.vmem [shape: f32[16,32], index: 0, kind: input, shape index: {}]   ;;  %s407_s3 = inlined_call_operand.vmem [shape: f32[128,128], index: 3, kind: input, shape index: {}]   ;;  %s408_s2 = inlined_call_operand.vmem [shape: f32[1,128], index: 2, kind: input, shape index: {}]   ;;  %s409_s4 = inlined_call_operand.vmem [shape: f32[1,128], index: 4, kind: input, shape index: {}]   ;;  %s410_s5 = inlined_call_operand.vmem [shape: f32[16,128], index: 5, kind: output, shape index: {}]  }
   0x1   :  { %v25_v0 = vld [vmem:[%s405_s1 + $0x18] sm:$0xff]  ;;  %v24_v1 = vld [vmem:[%s405_s1 + $0x10] sm:$0xff]  ;;  %v20_v2 = vld [vmem:[%s406_s0] sm:$0xff] }
   0x2   :  { %249 = vmatprep.subr.mxu0 %v25_v0  ;;  %v23_v3 = vld [vmem:[%s405_s1 + $0x8] sm:$0xff]  ;;  %257 = vmatprep.mubr.msk.f32.mxu0 %vm33_vm0, %v20_v2  ;;  %v132_v4 = vld [vmem:[%s407_s3 + $0x78] sm:$0xff]  ;;  %v131_v5 = vld [vmem:[%s407_s3 + $0x70] sm:$0xff] }
   0x3   :  { %250 = vmatpush3.msra.mxu0 %v25_v0  ;;  %260 = vmatprep.subr.mxu1 %v132_v4  ;;  %v22_v6 = vld [vmem:[%s405_s1] sm:$0xff]  ;;  %v130_v7 = vld [vmem:[%s407_s3 + $0x68] sm:$0xff]  ;;  %v128_v10 = vld [vmem:[%s407_s3 + $0x58] sm:$0xff] }
   0x4   :  { %251 = vmatprep.subr.mxu0 %v24_v1  ;;  %261 = vmatpush3.msra.mxu1 %v132_v4  ;;  %v21_v8 = vld [vmem:[%s406_s0 + $0x8] sm:$0xff]  ;;  %v129_v9 = vld [vmem:[%s407_s3 + $0x60] sm:$0xff]  ;;  %v127_v11 = vld [vmem:[%s407_s3 + $0x50] sm:$0xff] }
   0x5   :  { %252 = vmatpush3.msra.mxu0 %v24_v1  ;;  %262 = vmatprep.subr.mxu1 %v131_v5  ;;  %v126_v12 = vld [vmem:[%s407_s3 + $0x48] sm:$0xff]  ;;  %v125_v13 = vld [vmem:[%s407_s3 + $0x40] sm:$0xff]  ;;  %v124_v14 = vld [vmem:[%s407_s3 + $0x38] sm:$0xff] }
   0x6   :  { %253 = vmatprep.subr.mxu0 %v23_v3  ;;  %263 = vmatpush3.msra.mxu1 %v131_v5  ;;  %v123_v15 = vld [vmem:[%s407_s3 + $0x30] sm:$0xff]  ;;  %v122_v16 = vld [vmem:[%s407_s3 + $0x28] sm:$0xff]  ;;  %v121_v17 = vld [vmem:[%s407_s3 + $0x20] sm:$0xff] }
   0x7   :  { %254 = vmatpush3.msra.mxu0 %v23_v3  ;;  %264 = vmatprep.subr.mxu1 %v130_v7  ;;  %v120_v18 = vld [vmem:[%s407_s3 + $0x18] sm:$0xff]  ;;  %v119_v19 = vld [vmem:[%s407_s3 + $0x10] sm:$0xff]  ;;  %v118_v20 = vld [vmem:[%s407_s3 + $0x8] sm:$0xff] }
   0x8   :  { %255 = vmatprep.subr.mxu0 %v22_v6  ;;  %265 = vmatpush3.msra.mxu1 %v130_v7  ;;  %v117_v21 = vld [vmem:[%s407_s3] sm:$0xff] }
   0x9   :  { %256 = vmatpush3.msra.mxu0 %v22_v6  ;;  %266 = vmatprep.subr.mxu1 %v129_v9  ;;  %v221_v22 = vld [vmem:[%s408_s2] ss:$0 sm:$0xff] }
   0xa   :  { %258 = vmatmul.mubr.msk.f32.vlgmr.msra.gmra.mxu0 %vm33_vm0, %v21_v8  ;;  %267 = vmatpush3.msra.mxu1 %v129_v9  ;;  %v224_v29 = vld [vmem:[%s409_s4] ss:$0 sm:$0xff] }
   0xb   :  { %268 = vmatprep.subr.mxu1 %v128_v10 }
   0xc   :  { %269 = vmatpush3.msra.mxu1 %v128_v10 }
   0xd   :  { %270 = vmatprep.subr.mxu1 %v127_v11 }
   0xe   :  { %271 = vmatpush3.msra.mxu1 %v127_v11 }
   0xf   :  { %272 = vmatprep.subr.mxu1 %v126_v12 }
  0x10   :  { %273 = vmatpush3.msra.mxu1 %v126_v12 }
  0x11   :  { %274 = vmatprep.subr.mxu1 %v125_v13 }
  0x12   :  { %275 = vmatpush3.msra.mxu1 %v125_v13 }
  0x13   :  { %276 = vmatprep.subr.mxu1 %v124_v14 }
  0x14   :  { %277 = vmatpush3.msra.mxu1 %v124_v14 }
  0x15   :  { %278 = vmatprep.subr.mxu1 %v123_v15 }
  0x16   :  { %279 = vmatpush3.msra.mxu1 %v123_v15 }
  0x17   :  { %280 = vmatprep.subr.mxu1 %v122_v16 }
  0x18   :  { %281 = vmatpush3.msra.mxu1 %v122_v16 }
  0x19   :  { %282 = vmatprep.subr.mxu1 %v121_v17 }
  0x1a   :  { %283 = vmatpush3.msra.mxu1 %v121_v17 }
  0x1b   :  { %284 = vmatprep.subr.mxu1 %v120_v18 }
  0x1c   :  { %285 = vmatpush3.msra.mxu1 %v120_v18 }
  0x1d   :  { %286 = vmatprep.subr.mxu1 %v119_v19 }
  0x1e   :  { %287 = vmatpush3.msra.mxu1 %v119_v19 }
  0x1f   :  { %288 = vmatprep.subr.mxu1 %v118_v20 }
  0x20   :  { %289 = vmatpush3.msra.mxu1 %v118_v20 }
  0x21   :  { %290 = vmatprep.subr.mxu1 %v117_v21 }
  0x22   :  { %291 = vmatpush3.msra.mxu1 %v117_v21 }
  0xca   :  { %v259_v23 = vpop.f32.mrf.mxu0 }
  0xcb   :  { %v112_v24 = vadd.f32 %v259_v23, %v221_v22 }
  0xcc   :  { %v106_v25 = vpop.f32.mrf.mxu0 }
  0xcd   :  { %v107_v26 = vadd.f32 %v221_v22, %v106_v25  ;;  %v116_v28 = vmax.f32 %v112_v24, 0.0 }
  0xcf   :  { %v115_v27 = vmax.f32 %v107_v26, 0.0 }
  0xd1   :  { %292 = vmatprep.mubr.f32.mxu1 %v115_v27 }
  0xd2   :  { %293 = vmatmul.mubr.f32.vlgmr.msra.gmra.mxu1 %v116_v28 }
 0x192   :  { %v294_v30 = vpop.f32.mrf.mxu1 }
 0x193   :  { %v212_v31 = vadd.f32 %v294_v30, %v224_v29 }
 0x194   :  { %v206_v32 = vpop.f32.mrf.mxu1 }
 0x195   :  { %216 = vst [vmem:[%s410_s5 + $0x8] sm:$0xff] %v212_v31  ;;  %v207_v33 = vadd.f32 %v224_v29, %v206_v32 }
 0x197   :  { %215 = vst [vmem:[%s410_s5] sm:$0xff] %v207_v33 }

</bundles_post_ra>
